<compile_context>
chip_gen: v5e
topology: v5e:2x2
jax: 0.10.0
libtpu: 0.0.40
codegen_flags: <defaults>
</compile_context>

<pallas_src>
import functools

import jax
import jax.numpy as jnp
from jax import lax
from jax.experimental import pallas as pl
from jax.experimental.pallas import tpu as pltpu


def _tcn_kernel(xpad_ref, w_ref, b_ref, out_ref, *, kernel_size, dilation, h_tile):
    # xpad_ref : (1, H+2, W + (K-1)*d, Cin)   compute dtype (f32 or bf16)
    # w_ref    : (3*K, Cin, Cout)             compute dtype (skip already folded in)
    # b_ref    : (1, Cout)                    f32 (conv bias + skip bias)
    # out_ref  : (1, h_tile, W, Cout)         output dtype
    W = out_ref.shape[2]
    h0 = pl.multiple_of(pl.program_id(1) * h_tile, h_tile)  # first output row of this tile

    # f32 register accumulator; h_tile is chosen so this stays a handful of vregs.
    acc = jnp.zeros(out_ref.shape[1:], dtype=jnp.float32)

    # Dilated (3, K) conv as 3*K shifted channel-contraction matmuls (MXU),
    # each tap sliced directly from the resident input block (static W offset,
    # cheap dynamic H offset).
    for kh in range(3):
        for kw in range(kernel_size):
            tile = xpad_ref[0, pl.ds(h0 + kh, h_tile),
                            pl.ds(kw * dilation, W), :]          # (h_tile, W, Cin)
            wkk = w_ref[kh * kernel_size + kw]                    # (Cin, Cout)
            acc = acc + lax.dot_general(
                tile, wkk,
                dimension_numbers=(((2,), (0,)), ((), ())),
                preferred_element_type=jnp.float32)

    # TODO(synk): nn.Dropout omitted (inference/eval semantics -> identity).
    out_ref[0] = (acc + b_ref[0]).astype(out_ref.dtype)


def _pick_h_tile(H, W, Cout, acc_budget_bytes=128 * 1024):
    """Largest divisor of H whose f32 accumulator fits the vreg budget."""
    cap = max(1, acc_budget_bytes // max(1, W * Cout * 4))
    if cap >= H:
        return H
    for t in range(min(cap, H), 0, -1):
        if H % t == 0:
            return t
    return H


def tcn_block_forward(x_nchw, w_conv, b_conv, w_skip=None, b_skip=None, *,
                      kernel_size, dilation, compute_dtype=None, h_tile=None):
    """TcnBlock forward.

    x_nchw : (B, Cin, H, W)   w_conv : (Cout, Cin, 3, K) [OIHW]   b_conv : (Cout,)
    w_skip : (Cin, Cout) or None (identity shortcut when c_in == c_out)
    b_skip : (Cout,) or None
    compute_dtype: dtype fed to the MXU (e.g. jnp.bfloat16 on v6e/v7x);
                   accumulation is always f32.
    Returns (B, Cout, H, W).
    """
    B, Cin, H, W = x_nchw.shape
    Cout = w_conv.shape[0]
    K = kernel_size
    pad_w = (K - 1) * dilation
    out_dtype = x_nchw.dtype
    if compute_dtype is None:
        compute_dtype = x_nchw.dtype
    if w_skip is None:                      # PyTorch: shortcut is identity when c_in == c_out
        assert Cin == Cout, "identity shortcut requires c_in == c_out"
        w_skip = jnp.eye(Cin, dtype=w_conv.dtype)
    if b_skip is None:
        b_skip = jnp.zeros((Cout,), dtype=w_conv.dtype)

    # ---- weight prep (tiny, pure-JAX glue) -------------------------------------
    # OIHW -> (3, K, Cin, Cout); fold the 1x1 skip into the (kh=1, kw=K-1) tap,
    # which reads exactly the un-shifted original x from the padded input.
    w = jnp.transpose(w_conv, (2, 3, 1, 0))
    w = w.at[1, K - 1].add(w_skip.astype(w.dtype))
    w = w.reshape(3 * K, Cin, Cout).astype(compute_dtype)
    b = (b_conv + b_skip).astype(jnp.float32).reshape(1, Cout)

    # ---- input prep ------------------------------------------------------------
    # NCHW -> NHWC, pad H symmetrically by 1, pad W causally on the left
    # (conv padding + chomp == causal left pad).  Transpose + pad fuse into a
    # single XLA pass.
    # TODO(synk): in a full-model integration keep NHWC end-to-end (and fold the
    # padding into the kernel with boundary masking) to drop this HBM round trip.
    x = jnp.transpose(x_nchw, (0, 2, 3, 1))
    x_pad = jnp.pad(x, ((0, 0), (1, 1), (pad_w, 0), (0, 0))).astype(compute_dtype)

    if h_tile is None:
        h_tile = _pick_h_tile(H, W, Cout)
    if H % h_tile:
        h_tile = H            # safety: ragged H tiling not implemented

    kernel = functools.partial(_tcn_kernel, kernel_size=K, dilation=dilation,
                               h_tile=h_tile)

    out_nhwc = pl.pallas_call(
        kernel,
        out_shape=jax.ShapeDtypeStruct((B, H, W, Cout), out_dtype),
        grid_spec=pltpu.PrefetchScalarGridSpec(
            num_scalar_prefetch=0,
            grid=(B, H // h_tile),
            in_specs=[
                # Full padded image per batch element; block index constant along
                # the h axis -> fetched once per b, reused by every h tile.
                pl.BlockSpec((1, H + 2, W + pad_w, Cin), lambda b, h: (b, 0, 0, 0)),
                pl.BlockSpec((3 * K, Cin, Cout), lambda b, h: (0, 0, 0)),
                pl.BlockSpec((1, Cout), lambda b, h: (0, 0)),
            ],
            # Trailing block dims (W, Cout) equal the full array dims, so each
            # output tile is one contiguous HBM DMA with no zero-padding bytes.
            out_specs=pl.BlockSpec((1, h_tile, W, Cout),
                                   lambda b, h: (b, h, 0, 0)),
        ),
        compiler_params=pltpu.CompilerParams(
            dimension_semantics=("parallel", "parallel")),
    )(x_pad, w, b)

    # Back to NCHW (single transpose, exact bytes -- no channel padding to strip).
    return jnp.transpose(out_nhwc, (0, 3, 1, 2))


def tcn_block_reference(x, w_conv, b_conv, w_skip, b_skip, kernel_size, dilation):
    """Pure-JAX reference matching the PyTorch forward (eval mode)."""
    pad_w = (kernel_size - 1) * dilation
    out = lax.conv_general_dilated(
        x, w_conv, window_strides=(1, 1),
        padding=((1, 1), (pad_w, pad_w)),
        rhs_dilation=(1, dilation),
        dimension_numbers=("NCHW", "OIHW", "NCHW"))
    if pad_w > 0:
        out = out[:, :, :, :-pad_w]                    # Chomp
    out = out + b_conv[None, :, None, None]
    skip = jnp.einsum("bchw,cd->bdhw", x, w_skip) + b_skip[None, :, None, None]
    return out + skip


if __name__ == "__main__":
    key = jax.random.PRNGKey(0)
    k1, k2, k3, k4, k5, k6, k7 = jax.random.split(key, 7)

    # ---- case 1: c_in != c_out -> explicit 1x1 shortcut (folded into conv) ----
    B, Cin, Cout, H, W = 2, 4, 8, 16, 8
    kernel_size, dilation = 3, 2
    x = jax.random.normal(k1, (B, Cin, H, W), dtype=jnp.float32)
    w_conv = 0.1 * jax.random.normal(k2, (Cout, Cin, 3, kernel_size), dtype=jnp.float32)
    b_conv = 0.1 * jax.random.normal(k3, (Cout,), dtype=jnp.float32)
    w_skip = 0.1 * jax.random.normal(k4, (Cin, Cout), dtype=jnp.float32)
    b_skip = 0.1 * jax.random.normal(k5, (Cout,), dtype=jnp.float32)

    ref = tcn_block_reference(x, w_conv, b_conv, w_skip, b_skip, kernel_size, dilation)

    out = tcn_block_forward(x, w_conv, b_conv, w_skip, b_skip,
                            kernel_size=kernel_size, dilation=dilation)
    out = jax.block_until_ready(out)
    assert out.shape == (B, Cout, H, W), out.shape
    err = float(jnp.max(jnp.abs(out - ref)))
    if err > 1e-4:
        raise AssertionError(f"Pallas f32 output mismatch (skip conv), max abs err = {err}")

    # bf16 inputs/weights with f32 accumulation (v6e/v7x) -- looser tolerance.
    out_bf16 = tcn_block_forward(x, w_conv, b_conv, w_skip, b_skip,
                                 kernel_size=kernel_size, dilation=dilation,
                                 compute_dtype=jnp.bfloat16)
    out_bf16 = jax.block_until_ready(out_bf16)
    err_bf16 = float(jnp.max(jnp.abs(out_bf16 - ref)))
    if err_bf16 > 5e-2:
        raise AssertionError(f"Pallas bf16 output mismatch, max abs err = {err_bf16}")

    # ---- case 2: c_in == c_out -> identity shortcut ---------------------------
    C2 = 8
    x2 = jax.random.normal(k6, (B, C2, H, W), dtype=jnp.float32)
    w_conv2 = 0.1 * jax.random.normal(k7, (C2, C2, 3, kernel_size), dtype=jnp.float32)
    b_conv2 = jnp.zeros((C2,), dtype=jnp.float32)
    ref2 = tcn_block_reference(x2, w_conv2, b_conv2,
                               jnp.eye(C2, dtype=jnp.float32),
                               jnp.zeros((C2,), dtype=jnp.float32),
                               kernel_size, dilation)
    out2 = tcn_block_forward(x2, w_conv2, b_conv2, None, None,
                             kernel_size=kernel_size, dilation=dilation)
    out2 = jax.block_until_ready(out2)
    err2 = float(jnp.max(jnp.abs(out2 - ref2)))
    if err2 > 1e-4:
        raise AssertionError(f"Pallas f32 output mismatch (identity skip), max abs err = {err2}")

    print("KERNEL_OK")
</pallas_src>

<mosaic_0001>
module attributes {stable_mosaic.version = 11 : i64} {
  func.func @_tcn_kernel(%arg0: i32, %arg1: i32, %arg2: memref<1x18x12x4xf32, #tpu.memory_space<vmem>>, %arg3: memref<9x4x8xf32, #tpu.memory_space<vmem>>, %arg4: memref<1x8xf32, #tpu.memory_space<vmem>>, %arg5: memref<1x16x8x8xf32, #tpu.memory_space<vmem>>) attributes {dimension_semantics = [#tpu.dimension_semantics<parallel>, #tpu.dimension_semantics<parallel>], iteration_bounds = array<i64: 2, 1>, scalar_prefetch = 0 : i64, scratch_operands = 0 : i64, tpu.core_type = #tpu.core_type<tc>, window_params = [{transform_indices = @transform_0, window_bounds = array<i64: 1, 18, 12, 4>}, {pipeline_mode = #tpu.pipeline_mode<synchronous>, transform_indices = @transform_1, window_bounds = array<i64: 9, 4, 8>}, {pipeline_mode = #tpu.pipeline_mode<synchronous>, transform_indices = @transform_2, window_bounds = array<i64: 1, 8>}, {transform_indices = @transform_3, window_bounds = array<i64: 1, 16, 8, 8>}]} {
    %c16_i32 = arith.constant 16 : i32
    %0 = arith.muli %arg1, %c16_i32 : i32
    %1 = tpu.assume_multiple %0, 16 : i32
    %cst = arith.constant 0.000000e+00 : f32
    %2 = vector.broadcast %cst : f32 to vector<16x8x8xf32>
    %c0_i32 = arith.constant 0 : i32
    %3 = arith.addi %1, %c0_i32 : i32
    %c0 = arith.constant 0 : index
    %4 = arith.index_cast %3 : i32 to index
    %c0_0 = arith.constant 0 : index
    %c0_1 = arith.constant 0 : index
    %5 = vector.load %arg2[%c0, %4, %c0_0, %c0_1] : memref<1x18x12x4xf32, #tpu.memory_space<vmem>>, vector<1x16x8x4xf32>
    %6 = vector.shape_cast %5 : vector<1x16x8x4xf32> to vector<16x8x4xf32>
    %c0_2 = arith.constant 0 : index
    %c0_3 = arith.constant 0 : index
    %c0_4 = arith.constant 0 : index
    %7 = vector.load %arg3[%c0_2, %c0_3, %c0_4] : memref<9x4x8xf32, #tpu.memory_space<vmem>>, vector<1x4x8xf32>
    %8 = vector.shape_cast %7 : vector<1x4x8xf32> to vector<4x8xf32>
    %cst_5 = arith.constant dense<0.000000e+00> : vector<16x8x8xf32>
    %9 = tpu.matmul %6, %8, %cst_5 {dimension_numbers = #tpu.dot_dimension_numbers<[2], [0], [0, 1], [1], [0, 0, 0, 1, 1, 1], [], []>} : vector<16x8x4xf32>, vector<4x8xf32>, vector<16x8x8xf32> -> vector<16x8x8xf32>
    %10 = arith.addf %2, %9 : vector<16x8x8xf32>
    %c0_i32_6 = arith.constant 0 : i32
    %11 = arith.addi %1, %c0_i32_6 : i32
    %c0_7 = arith.constant 0 : index
    %12 = arith.index_cast %11 : i32 to index
    %c2 = arith.constant 2 : index
    %c0_8 = arith.constant 0 : index
    %13 = vector.load %arg2[%c0_7, %12, %c2, %c0_8] : memref<1x18x12x4xf32, #tpu.memory_space<vmem>>, vector<1x16x8x4xf32>
    %14 = vector.shape_cast %13 : vector<1x16x8x4xf32> to vector<16x8x4xf32>
    %c1 = arith.constant 1 : index
    %c0_9 = arith.constant 0 : index
    %c0_10 = arith.constant 0 : index
    %15 = vector.load %arg3[%c1, %c0_9, %c0_10] : memref<9x4x8xf32, #tpu.memory_space<vmem>>, vector<1x4x8xf32>
    %16 = vector.shape_cast %15 : vector<1x4x8xf32> to vector<4x8xf32>
    %cst_11 = arith.constant dense<0.000000e+00> : vector<16x8x8xf32>
    %17 = tpu.matmul %14, %16, %cst_11 {dimension_numbers = #tpu.dot_dimension_numbers<[2], [0], [0, 1], [1], [0, 0, 0, 1, 1, 1], [], []>} : vector<16x8x4xf32>, vector<4x8xf32>, vector<16x8x8xf32> -> vector<16x8x8xf32>
    %18 = arith.addf %10, %17 : vector<16x8x8xf32>
    %c0_i32_12 = arith.constant 0 : i32
    %19 = arith.addi %1, %c0_i32_12 : i32
    %c0_13 = arith.constant 0 : index
    %20 = arith.index_cast %19 : i32 to index
    %c4 = arith.constant 4 : index
    %c0_14 = arith.constant 0 : index
    %21 = vector.load %arg2[%c0_13, %20, %c4, %c0_14] : memref<1x18x12x4xf32, #tpu.memory_space<vmem>>, vector<1x16x8x4xf32>
    %22 = vector.shape_cast %21 : vector<1x16x8x4xf32> to vector<16x8x4xf32>
    %c2_15 = arith.constant 2 : index
    %c0_16 = arith.constant 0 : index
    %c0_17 = arith.constant 0 : index
    %23 = vector.load %arg3[%c2_15, %c0_16, %c0_17] : memref<9x4x8xf32, #tpu.memory_space<vmem>>, vector<1x4x8xf32>
    %24 = vector.shape_cast %23 : vector<1x4x8xf32> to vector<4x8xf32>
    %cst_18 = arith.constant dense<0.000000e+00> : vector<16x8x8xf32>
    %25 = tpu.matmul %22, %24, %cst_18 {dimension_numbers = #tpu.dot_dimension_numbers<[2], [0], [0, 1], [1], [0, 0, 0, 1, 1, 1], [], []>} : vector<16x8x4xf32>, vector<4x8xf32>, vector<16x8x8xf32> -> vector<16x8x8xf32>
    %26 = arith.addf %18, %25 : vector<16x8x8xf32>
    %c1_i32 = arith.constant 1 : i32
    %27 = arith.addi %1, %c1_i32 : i32
    %c0_19 = arith.constant 0 : index
    %28 = arith.index_cast %27 : i32 to index
    %c0_20 = arith.constant 0 : index
    %c0_21 = arith.constant 0 : index
    %29 = vector.load %arg2[%c0_19, %28, %c0_20, %c0_21] : memref<1x18x12x4xf32, #tpu.memory_space<vmem>>, vector<1x16x8x4xf32>
    %30 = vector.shape_cast %29 : vector<1x16x8x4xf32> to vector<16x8x4xf32>
    %c3 = arith.constant 3 : index
    %c0_22 = arith.constant 0 : index
    %c0_23 = arith.constant 0 : index
    %31 = vector.load %arg3[%c3, %c0_22, %c0_23] : memref<9x4x8xf32, #tpu.memory_space<vmem>>, vector<1x4x8xf32>
    %32 = vector.shape_cast %31 : vector<1x4x8xf32> to vector<4x8xf32>
    %cst_24 = arith.constant dense<0.000000e+00> : vector<16x8x8xf32>
    %33 = tpu.matmul %30, %32, %cst_24 {dimension_numbers = #tpu.dot_dimension_numbers<[2], [0], [0, 1], [1], [0, 0, 0, 1, 1, 1], [], []>} : vector<16x8x4xf32>, vector<4x8xf32>, vector<16x8x8xf32> -> vector<16x8x8xf32>
    %34 = arith.addf %26, %33 : vector<16x8x8xf32>
    %c1_i32_25 = arith.constant 1 : i32
    %35 = arith.addi %1, %c1_i32_25 : i32
    %c0_26 = arith.constant 0 : index
    %36 = arith.index_cast %35 : i32 to index
    %c2_27 = arith.constant 2 : index
    %c0_28 = arith.constant 0 : index
    %37 = vector.load %arg2[%c0_26, %36, %c2_27, %c0_28] : memref<1x18x12x4xf32, #tpu.memory_space<vmem>>, vector<1x16x8x4xf32>
    %38 = vector.shape_cast %37 : vector<1x16x8x4xf32> to vector<16x8x4xf32>
    %c4_29 = arith.constant 4 : index
    %c0_30 = arith.constant 0 : index
    %c0_31 = arith.constant 0 : index
    %39 = vector.load %arg3[%c4_29, %c0_30, %c0_31] : memref<9x4x8xf32, #tpu.memory_space<vmem>>, vector<1x4x8xf32>
    %40 = vector.shape_cast %39 : vector<1x4x8xf32> to vector<4x8xf32>
    %cst_32 = arith.constant dense<0.000000e+00> : vector<16x8x8xf32>
    %41 = tpu.matmul %38, %40, %cst_32 {dimension_numbers = #tpu.dot_dimension_numbers<[2], [0], [0, 1], [1], [0, 0, 0, 1, 1, 1], [], []>} : vector<16x8x4xf32>, vector<4x8xf32>, vector<16x8x8xf32> -> vector<16x8x8xf32>
    %42 = arith.addf %34, %41 : vector<16x8x8xf32>
    %c1_i32_33 = arith.constant 1 : i32
    %43 = arith.addi %1, %c1_i32_33 : i32
    %c0_34 = arith.constant 0 : index
    %44 = arith.index_cast %43 : i32 to index
    %c4_35 = arith.constant 4 : index
    %c0_36 = arith.constant 0 : index
    %45 = vector.load %arg2[%c0_34, %44, %c4_35, %c0_36] : memref<1x18x12x4xf32, #tpu.memory_space<vmem>>, vector<1x16x8x4xf32>
    %46 = vector.shape_cast %45 : vector<1x16x8x4xf32> to vector<16x8x4xf32>
    %c5 = arith.constant 5 : index
    %c0_37 = arith.constant 0 : index
    %c0_38 = arith.constant 0 : index
    %47 = vector.load %arg3[%c5, %c0_37, %c0_38] : memref<9x4x8xf32, #tpu.memory_space<vmem>>, vector<1x4x8xf32>
    %48 = vector.shape_cast %47 : vector<1x4x8xf32> to vector<4x8xf32>
    %cst_39 = arith.constant dense<0.000000e+00> : vector<16x8x8xf32>
    %49 = tpu.matmul %46, %48, %cst_39 {dimension_numbers = #tpu.dot_dimension_numbers<[2], [0], [0, 1], [1], [0, 0, 0, 1, 1, 1], [], []>} : vector<16x8x4xf32>, vector<4x8xf32>, vector<16x8x8xf32> -> vector<16x8x8xf32>
    %50 = arith.addf %42, %49 : vector<16x8x8xf32>
    %c2_i32 = arith.constant 2 : i32
    %51 = arith.addi %1, %c2_i32 : i32
    %c0_40 = arith.constant 0 : index
    %52 = arith.index_cast %51 : i32 to index
    %c0_41 = arith.constant 0 : index
    %c0_42 = arith.constant 0 : index
    %53 = vector.load %arg2[%c0_40, %52, %c0_41, %c0_42] : memref<1x18x12x4xf32, #tpu.memory_space<vmem>>, vector<1x16x8x4xf32>
    %54 = vector.shape_cast %53 : vector<1x16x8x4xf32> to vector<16x8x4xf32>
    %c6 = arith.constant 6 : index
    %c0_43 = arith.constant 0 : index
    %c0_44 = arith.constant 0 : index
    %55 = vector.load %arg3[%c6, %c0_43, %c0_44] : memref<9x4x8xf32, #tpu.memory_space<vmem>>, vector<1x4x8xf32>
    %56 = vector.shape_cast %55 : vector<1x4x8xf32> to vector<4x8xf32>
    %cst_45 = arith.constant dense<0.000000e+00> : vector<16x8x8xf32>
    %57 = tpu.matmul %54, %56, %cst_45 {dimension_numbers = #tpu.dot_dimension_numbers<[2], [0], [0, 1], [1], [0, 0, 0, 1, 1, 1], [], []>} : vector<16x8x4xf32>, vector<4x8xf32>, vector<16x8x8xf32> -> vector<16x8x8xf32>
    %58 = arith.addf %50, %57 : vector<16x8x8xf32>
    %c2_i32_46 = arith.constant 2 : i32
    %59 = arith.addi %1, %c2_i32_46 : i32
    %c0_47 = arith.constant 0 : index
    %60 = arith.index_cast %59 : i32 to index
    %c2_48 = arith.constant 2 : index
    %c0_49 = arith.constant 0 : index
    %61 = vector.load %arg2[%c0_47, %60, %c2_48, %c0_49] : memref<1x18x12x4xf32, #tpu.memory_space<vmem>>, vector<1x16x8x4xf32>
    %62 = vector.shape_cast %61 : vector<1x16x8x4xf32> to vector<16x8x4xf32>
    %c7 = arith.constant 7 : index
    %c0_50 = arith.constant 0 : index
    %c0_51 = arith.constant 0 : index
    %63 = vector.load %arg3[%c7, %c0_50, %c0_51] : memref<9x4x8xf32, #tpu.memory_space<vmem>>, vector<1x4x8xf32>
    %64 = vector.shape_cast %63 : vector<1x4x8xf32> to vector<4x8xf32>
    %cst_52 = arith.constant dense<0.000000e+00> : vector<16x8x8xf32>
    %65 = tpu.matmul %62, %64, %cst_52 {dimension_numbers = #tpu.dot_dimension_numbers<[2], [0], [0, 1], [1], [0, 0, 0, 1, 1, 1], [], []>} : vector<16x8x4xf32>, vector<4x8xf32>, vector<16x8x8xf32> -> vector<16x8x8xf32>
    %66 = arith.addf %58, %65 : vector<16x8x8xf32>
    %c2_i32_53 = arith.constant 2 : i32
    %67 = arith.addi %1, %c2_i32_53 : i32
    %c0_54 = arith.constant 0 : index
    %68 = arith.index_cast %67 : i32 to index
    %c4_55 = arith.constant 4 : index
    %c0_56 = arith.constant 0 : index
    %69 = vector.load %arg2[%c0_54, %68, %c4_55, %c0_56] : memref<1x18x12x4xf32, #tpu.memory_space<vmem>>, vector<1x16x8x4xf32>
    %70 = vector.shape_cast %69 : vector<1x16x8x4xf32> to vector<16x8x4xf32>
    %c8 = arith.constant 8 : index
    %c0_57 = arith.constant 0 : index
    %c0_58 = arith.constant 0 : index
    %71 = vector.load %arg3[%c8, %c0_57, %c0_58] : memref<9x4x8xf32, #tpu.memory_space<vmem>>, vector<1x4x8xf32>
    %72 = vector.shape_cast %71 : vector<1x4x8xf32> to vector<4x8xf32>
    %cst_59 = arith.constant dense<0.000000e+00> : vector<16x8x8xf32>
    %73 = tpu.matmul %70, %72, %cst_59 {dimension_numbers = #tpu.dot_dimension_numbers<[2], [0], [0, 1], [1], [0, 0, 0, 1, 1, 1], [], []>} : vector<16x8x4xf32>, vector<4x8xf32>, vector<16x8x8xf32> -> vector<16x8x8xf32>
    %74 = arith.addf %66, %73 : vector<16x8x8xf32>
    %c0_60 = arith.constant 0 : index
    %c0_61 = arith.constant 0 : index
    %75 = vector.load %arg4[%c0_60, %c0_61] : memref<1x8xf32, #tpu.memory_space<vmem>>, vector<1x8xf32>
    %76 = vector.shape_cast %75 : vector<1x8xf32> to vector<8xf32>
    %77 = vector.shape_cast %76 : vector<8xf32> to vector<1x1x8xf32>
    %78 = vector.broadcast %77 : vector<1x1x8xf32> to vector<16x8x8xf32>
    %79 = arith.addf %74, %78 : vector<16x8x8xf32>
    %c0_62 = arith.constant 0 : index
    %c0_63 = arith.constant 0 : index
    %c0_64 = arith.constant 0 : index
    %c0_65 = arith.constant 0 : index
    %80 = vector.load %arg5[%c0_62, %c0_63, %c0_64, %c0_65] : memref<1x16x8x8xf32, #tpu.memory_space<vmem>>, vector<1x16x8x8xf32>
    %81 = vector.shape_cast %80 : vector<1x16x8x8xf32> to vector<16x8x8xf32>
    %82 = vector.shape_cast %79 : vector<16x8x8xf32> to vector<1x16x8x8xf32>
    tpu.vector_store %arg5[%c0_62, %c0_63, %c0_64, %c0_65], %82 {strides = array<i32>} : memref<1x16x8x8xf32, #tpu.memory_space<vmem>>, vector<1x16x8x8xf32>,
    return
  }
  func.func @transform_0(%arg0: i32, %arg1: i32) -> (i32, i32, i32, i32) {
    %c0_i32 = arith.constant 0 : i32
    %c0_i32_0 = arith.constant 0 : i32
    %c0_i32_1 = arith.constant 0 : i32
    %c0_i32_2 = arith.constant 0 : i32
    return %arg0, %c0_i32, %c0_i32_0, %c0_i32_1 : i32, i32, i32, i32
  }
  func.func @transform_1(%arg0: i32, %arg1: i32) -> (i32, i32, i32) {
    %c0_i32 = arith.constant 0 : i32
    %c0_i32_0 = arith.constant 0 : i32
    %c0_i32_1 = arith.constant 0 : i32
    %c0_i32_2 = arith.constant 0 : i32
    return %c0_i32, %c0_i32_0, %c0_i32_1 : i32, i32, i32
  }
  func.func @transform_2(%arg0: i32, %arg1: i32) -> (i32, i32) {
    %c0_i32 = arith.constant 0 : i32
    %c0_i32_0 = arith.constant 0 : i32
    %c0_i32_1 = arith.constant 0 : i32
    return %c0_i32, %c0_i32_0 : i32, i32
  }
  func.func @transform_3(%arg0: i32, %arg1: i32) -> (i32, i32, i32, i32) {
    %c0_i32 = arith.constant 0 : i32
    %c0_i32_0 = arith.constant 0 : i32
    %c0_i32_1 = arith.constant 0 : i32
    return %arg0, %arg1, %c0_i32, %c0_i32_0 : i32, i32, i32, i32
  }
}

</mosaic_0001>

<bundles_post_ra>
// kernel: tpu_custom_call.1
= control target key start
LH: loop header
LB: loop body
LE: loop exit
PB: predicated region body
PF: predicated region fallthrough
CT: control target
= control target key end

     0   :  { %s1991_s12 = smov 0   ;;  %s1993_s13 = smov 0   ;;  %s2628_s0 = inlined_call_operand.vmem [shape: f32[2,18,12,4], index: 0, kind: input, shape index: {}]   ;;  %s2629_s1 = inlined_call_operand.vmem [shape: f32[9,4,8], index: 1, kind: input, shape index: {}]   ;;  %s2630_s2 = inlined_call_operand.vmem [shape: f32[1,8], index: 2, kind: input, shape index: {}]   ;;  %s2631_s3 = inlined_call_operand.vmem [shape: f32[2,16,8,8], index: 3, kind: output, shape index: {}]  }
   0x1   :  { %s1995_s14 = smov 0  }
   0x2 LB: > { %s25_s15 = sadd.s32 1, %s1965_s13  ;;  %p1654_p0 = scmp.ge.s32.totalorder %s1969_s14, 1  ;;  %s1969_s14 = sphi %s1995_s14, %s13_s14   ;;  %s1965_s13 = sphi %s1993_s13, %s2652_s13   ;;  %s1961_s12 = sphi %s1991_s12, %s2651_s12  }
   0x3   : > { %p27_p1 = scmp.ge.s32.totalorder %s25_s15, 2  ;;  %p151_p2 = scmp.lt.s32.totalorder %s1969_s14, 3 }
   0x5   : > { %s2654_s15 = smov (%p27_p1, %s25_s15), 0  ;;  %p152_p3 = pnand %p1654_p0, %p151_p2 }
   0x7   : > { %155 = sbr.rel (%p152_p3) target bundleno = 441 (0x1b9), region = 32 }
   0xc   : > { %v1658_v0 = vld [vmem:[%s2629_s1 + $0x4] sm:$0xf]  ;;  %vm281_vm0 = vcmask 1043456   ;;  %p179_p4 = scmp.lt.s32.totalorder %s1961_s12, 1  ;;  %v1693_v1 = vld [vmem:[%s2629_s1 + $0x8] sm:$0xf] }
   0xd   : > { %1918 = vmatpush.msk.msra.mxu1 %vm281_vm0, %v1658_v0  ;;  %1919 = vmatpush.msk.msra.mxu2 %vm281_vm0, %v1658_v0  ;;  %v1727_v2 = vld [vmem:[%s2629_s1 + $0xc] sm:$0xf]  ;;  %v213_v3 = vld [vmem:[%s2629_s1] sm:$0xf]  ;;  %v1761_v4 = vld [vmem:[%s2629_s1 + $0x10] sm:$0xf] }
   0xe   : > { %s2656_s12 = smov (!%p179_p4, %s1961_s12), 1  ;;  %1920 = vmatpush.msk.msra.mxu3 %vm281_vm0, %v1658_v0  ;;  %1659 = vmatpush.msk.msra.mxu0 %vm281_vm0, %v1658_v0  ;;  %vm232_vm1 = vcmask 31744   ;;  %v1829_v9 = vld [vmem:[%s2629_s1 + $0x18] sm:$0xf]  ;;  %v1863_v12 = vld [vmem:[%s2629_s1 + $0x1c] sm:$0xf] }
   0xf   : > { %1694 = vmatpush.msk.msrb.mxu2 %vm281_vm0, %v1693_v1  ;;  %1676 = vmatpush.msk.msrb.mxu1 %vm281_vm0, %v213_v3  ;;  %s1921_s26 = smul.u32 288, %s2656_s12  ;;  %v1795_v15 = vld [vmem:[%s2629_s1 + $0x14] sm:$0xf]  ;;  %v1897_v16 = vld [vmem:[%s2629_s1 + $0x20] sm:$0xf]  ;;  %s1917_s11 = sshll.u32 %s2656_s12, 7 }
  0x10   : > { %1728 = vmatpush.msk.msrb.mxu3 %vm281_vm0, %v1727_v2  ;;  %1762 = vmatpush.msk.msrb.mxu0 %vm281_vm0, %v1761_v4  ;;  %s2554_s20 = scalar_lea.vmem %s2631_s3, %s1917_s11  ;;  %vm1542_vm2 = vcmask 64512  }
  0x11   : > { %s2038_s29 = scalar_lea.vmem %s2628_s0, %s1921_s26 }
  0x12   : > { %v2041_v5 = vld [vmem:[%s2038_s29 + $0x42] sm:$0xff]  ;;  %v2061_v10 = vld [vmem:[%s2038_s29 + $0x52] sm:$0xff] }
  0x13   : > { %v2044_v6 = vld [vmem:[%s2038_s29 + $0x82] sm:$0xff]  ;;  %1664 = vmatmul.msk.f32.vlgmr.msra.gmra.mxu1 %vm232_vm1, %v2041_v5  ;;  %v2064_v11 = vld [vmem:[%s2038_s29 + $0x92] sm:$0xff] }
  0x14   : > { %v2047_v7 = vld [vmem:[%s2038_s29 + $0xc2] sm:$0xff]  ;;  %1668 = vmatmul.msk.f32.vlgmr.msra.gmra.mxu2 %vm232_vm1, %v2044_v6  ;;  %v2071_v13 = vld [vmem:[%s2038_s29 + $0xd2] sm:$0xff]  ;;  %1796 = vmatpush.msk.msra.mxu1 %vm281_vm0, %v1795_v15 }
  0x15   : > { %v214_v8 = vld [vmem:[%s2038_s29 + $0x2] sm:$0xff]  ;;  %1672 = vmatmul.msk.f32.vlgmr.msra.gmra.mxu3 %vm232_vm1, %v2047_v7  ;;  %1830 = vmatpush.msk.msra.mxu2 %vm281_vm0, %v1829_v9  ;;  %v215_v14 = vld [vmem:[%s2038_s29 + $0x12] sm:$0xff] }
  0x16   : > { %1660 = vmatmul.msk.f32.vlgmr.msra.gmra.mxu0 %vm232_vm1, %v214_v8  ;;  %1864 = vmatpush.msk.msra.mxu3 %vm281_vm0, %v1863_v12  ;;  %v2091_v17 = vld [vmem:[%s2038_s29 + $0x62] sm:$0xff]  ;;  %v2111_v21 = vld [vmem:[%s2038_s29 + $0x72] sm:$0xff] }
  0x17   : > { %1898 = vmatpush.msk.msra.mxu0 %vm281_vm0, %v1897_v16  ;;  %v2094_v18 = vld [vmem:[%s2038_s29 + $0xa2] sm:$0xff]  ;;  %v2114_v22 = vld [vmem:[%s2038_s29 + $0xb2] sm:$0xff] }
  0x18   : > { %v2097_v19 = vld [vmem:[%s2038_s29 + $0xe2] sm:$0xff]  ;;  %v2117_v23 = vld [vmem:[%s2038_s29 + $0xf2] sm:$0xff] }
  0x19   : > { %v2100_v20 = vld [vmem:[%s2038_s29 + $0x22] sm:$0xff]  ;;  %2637 = vst [vmem:[#allocation2_spill] sm:$0xff] %v2117_v23  ;;  %v2120_v24 = vld [vmem:[%s2038_s29 + $0x32] sm:$0xff] }
  0x1a   : > { %v197_v25 = vld [vmem:[%s2038_s29] sm:$0xff]  ;;  %v1711_v27 = vld [vmem:[%s2038_s29 + $0x10] sm:$0xff] }
  0x1b   : > { %1665 = vmatmul.msk.f32.gmra.mxu1 %vm232_vm1, %v2061_v10  ;;  %v466_v26 = vld [vmem:[%s2038_s29 + $0x4] sm:$0xff]  ;;  %v2138_v28 = vld [vmem:[%s2038_s29 + $0x14] sm:$0xff] }
  0x1c   : > { %1669 = vmatmul.msk.f32.gmra.mxu2 %vm232_vm1, %v2064_v11  ;;  %v2141_v29 = vld [vmem:[%s2038_s29 + $0x20] sm:$0xff]  ;;  %v2154_v31 = vld [vmem:[%s2038_s29 + $0x30] sm:$0xff] }
  0x1d   : > { %1673 = vmatmul.msk.f32.gmra.mxu3 %vm232_vm1, %v2071_v13  ;;  %v2151_v30 = vld [vmem:[%s2038_s29 + $0x24] sm:$0xff]  ;;  %v2165_v32 = vld [vmem:[%s2038_s29 + $0x34] sm:$0xff] }
  0x1e   : > { %1661 = vmatmul.msk.f32.gmra.mxu0 %vm232_vm1, %v215_v14  ;;  %v2168_v33 = vld [vmem:[%s2038_s29 + $0x40] sm:$0xff]  ;;  %v2182_v35 = vld [vmem:[%s2038_s29 + $0x50] sm:$0xff] }
  0x1f   : > { %v2179_v34 = vld [vmem:[%s2038_s29 + $0x44] sm:$0xff]  ;;  %v2193_v36 = vld [vmem:[%s2038_s29 + $0x54] sm:$0xff] }
  0x20   : > { %v2196_v37 = vld [vmem:[%s2038_s29 + $0x60] sm:$0xff]  ;;  %v2210_v39 = vld [vmem:[%s2038_s29 + $0x70] sm:$0xff] }
  0x21   : > { %v2207_v38 = vld [vmem:[%s2038_s29 + $0x64] sm:$0xff]  ;;  %v2221_v40 = vld [vmem:[%s2038_s29 + $0x74] sm:$0xff] }
  0x22   : > { %v2224_v41 = vld [vmem:[%s2038_s29 + $0x80] sm:$0xff]  ;;  %v2238_v43 = vld [vmem:[%s2038_s29 + $0x90] sm:$0xff] }
  0x23   : > { %1666 = vmatmul.msk.f32.gmra.mxu1 %vm232_vm1, %v2091_v17  ;;  %v2235_v42 = vld [vmem:[%s2038_s29 + $0x84] sm:$0xff]  ;;  %v2249_v44 = vld [vmem:[%s2038_s29 + $0x94] sm:$0xff] }
  0x24   : > { %1670 = vmatmul.msk.f32.gmra.mxu2 %vm232_vm1, %v2094_v18  ;;  %v2252_v45 = vld [vmem:[%s2038_s29 + $0xa0] sm:$0xff]  ;;  %v2266_v47 = vld [vmem:[%s2038_s29 + $0xb0] sm:$0xff] }
  0x25   : > { %1674 = vmatmul.msk.f32.gmra.mxu3 %vm232_vm1, %v2097_v19  ;;  %v2263_v46 = vld [vmem:[%s2038_s29 + $0xa4] sm:$0xff]  ;;  %v2277_v48 = vld [vmem:[%s2038_s29 + $0xb4] sm:$0xff] }
  0x26   : > { %1662 = vmatmul.msk.f32.gmra.mxu0 %vm232_vm1, %v2100_v20  ;;  %v2280_v49 = vld [vmem:[%s2038_s29 + $0xc0] sm:$0xff]  ;;  %v2296_v52 = vld [vmem:[%s2038_s29 + $0xd0] sm:$0xff] }
  0x27   : > { %v2293_v51 = vld [vmem:[%s2038_s29 + $0xc4] sm:$0xff]  ;;  %v2313_v57 = vld [vmem:[%s2038_s29 + $0xd4] sm:$0xff] }
  0x28   : > { %v2316_v58 = vld [vmem:[%s2038_s29 + $0xe0] sm:$0xff]  ;;  %v2336_v0 = vld [vmem:[%s2038_s29 + $0xf0] sm:$0xff] }
  0x29   : > { %v2333_v63 = vld [vmem:[%s2038_s29 + $0xe4] sm:$0xff]  ;;  %v2353_v8 = vld [vmem:[%s2038_s29 + $0xf4] sm:$0xff] }
  0x2a   : > { %2640 = vst [vmem:[#allocation5_spill] sm:$0xff] %v2353_v8  ;;  %v2356_v9 = vld [vmem:[%s2038_s29 + $0x100] sm:$0xff] }
  0x2b   : > { %1667 = vmatmul.msk.f32.gmra.mxu1 %vm232_vm1, %v2111_v21  ;;  %2641 = vst [vmem:[#allocation6_spill] sm:$0xff] %v2356_v9 }
  0x2c   : > { %1671 = vmatmul.msk.f32.gmra.mxu2 %vm232_vm1, %v2114_v22 }
  0x2d   : > { %1675 = vmatmul.msk.f32.gmra.mxu3 %vm232_vm1, %v2117_v23 }
  0x2e   : > { %1663 = vmatmul.msk.f32.gmra.mxu0 %vm232_vm1, %v2120_v24 }
  0x33   : > { %1677 = vmatmul.msk.f32.vlgmr.msrb.gmra.mxu1 %vm232_vm1, %v197_v25 }
  0x34   : > { %1695 = vmatmul.msk.f32.vlgmr.msrb.gmra.mxu2 %vm232_vm1, %v466_v26 }
  0x35   : > { %1729 = vmatmul.msk.f32.vlgmr.msrb.gmra.mxu3 %vm232_vm1, %v1711_v27 }
  0x36   : > { %1763 = vmatmul.msk.f32.vlgmr.msrb.gmra.mxu0 %vm232_vm1, %v215_v14  ;;  %v2359_v14 = vld [vmem:[%s2038_s29 + $0x102] sm:$0xff] }
  0x37   : > { %2642 = vst [vmem:[#allocation7_spill] sm:$0xff] %v2359_v14 }
  0x3b   : > { %1678 = vmatmul.msk.f32.gmra.mxu1 %vm232_vm1, %v1711_v27 }
  0x3c   : > { %1696 = vmatmul.msk.f32.gmra.mxu2 %vm232_vm1, %v2138_v28 }
  0x3d   : > { %1730 = vmatmul.msk.f32.gmra.mxu3 %vm232_vm1, %v2141_v29 }
  0x3e   : > { %1764 = vmatmul.msk.f32.gmra.mxu0 %vm232_vm1, %v2100_v20 }
  0x43   : > { %1679 = vmatmul.msk.f32.gmra.mxu1 %vm232_vm1, %v2141_v29 }
  0x44   : > { %1697 = vmatmul.msk.f32.gmra.mxu2 %vm232_vm1, %v2151_v30 }
  0x45   : > { %1731 = vmatmul.msk.f32.gmra.mxu3 %vm232_vm1, %v2154_v31 }
  0x46   : > { %1765 = vmatmul.msk.f32.gmra.mxu0 %vm232_vm1, %v2120_v24 }
  0x4b   : > { %1680 = vmatmul.msk.f32.gmra.mxu1 %vm232_vm1, %v2154_v31 }
  0x4c   : > { %1698 = vmatmul.msk.f32.gmra.mxu2 %vm232_vm1, %v2165_v32 }
  0x4d   : > { %1732 = vmatmul.msk.f32.gmra.mxu3 %vm232_vm1, %v2168_v33 }
  0x4e   : > { %1766 = vmatmul.msk.f32.gmra.mxu0 %vm232_vm1, %v2041_v5 }
  0x53   : > { %1681 = vmatmul.msk.f32.gmra.mxu1 %vm232_vm1, %v2168_v33 }
  0x54   : > { %1699 = vmatmul.msk.f32.gmra.mxu2 %vm232_vm1, %v2179_v34 }
  0x55   : > { %1733 = vmatmul.msk.f32.gmra.mxu3 %vm232_vm1, %v2182_v35 }
  0x56   : > { %1767 = vmatmul.msk.f32.gmra.mxu0 %vm232_vm1, %v2061_v10 }
  0x5b   : > { %1682 = vmatmul.msk.f32.gmra.mxu1 %vm232_vm1, %v2182_v35 }
  0x5c   : > { %1700 = vmatmul.msk.f32.gmra.mxu2 %vm232_vm1, %v2193_v36 }
  0x5d   : > { %1734 = vmatmul.msk.f32.gmra.mxu3 %vm232_vm1, %v2196_v37 }
  0x5e   : > { %1768 = vmatmul.msk.f32.gmra.mxu0 %vm232_vm1, %v2091_v17 }
  0x63   : > { %1683 = vmatmul.msk.f32.gmra.mxu1 %vm232_vm1, %v2196_v37 }
  0x64   : > { %1701 = vmatmul.msk.f32.gmra.mxu2 %vm232_vm1, %v2207_v38 }
  0x65   : > { %1735 = vmatmul.msk.f32.gmra.mxu3 %vm232_vm1, %v2210_v39 }
  0x66   : > { %1769 = vmatmul.msk.f32.gmra.mxu0 %vm232_vm1, %v2111_v21 }
  0x6b   : > { %1684 = vmatmul.msk.f32.gmra.mxu1 %vm232_vm1, %v2210_v39 }
  0x6c   : > { %1702 = vmatmul.msk.f32.gmra.mxu2 %vm232_vm1, %v2221_v40 }
  0x6d   : > { %1736 = vmatmul.msk.f32.gmra.mxu3 %vm232_vm1, %v2224_v41 }
  0x6e   : > { %1770 = vmatmul.msk.f32.gmra.mxu0 %vm232_vm1, %v2044_v6 }
  0x73   : > { %1685 = vmatmul.msk.f32.gmra.mxu1 %vm232_vm1, %v2224_v41 }
  0x74   : > { %1703 = vmatmul.msk.f32.gmra.mxu2 %vm232_vm1, %v2235_v42 }
  0x75   : > { %1737 = vmatmul.msk.f32.gmra.mxu3 %vm232_vm1, %v2238_v43 }
  0x76   : > { %1771 = vmatmul.msk.f32.gmra.mxu0 %vm232_vm1, %v2064_v11 }
  0x7b   : > { %1686 = vmatmul.msk.f32.gmra.mxu1 %vm232_vm1, %v2238_v43 }
  0x7c   : > { %1704 = vmatmul.msk.f32.gmra.mxu2 %vm232_vm1, %v2249_v44 }
  0x7d   : > { %1738 = vmatmul.msk.f32.gmra.mxu3 %vm232_vm1, %v2252_v45 }
  0x7e   : > { %1772 = vmatmul.msk.f32.gmra.mxu0 %vm232_vm1, %v2094_v18 }
  0x83   : > { %1687 = vmatmul.msk.f32.gmra.mxu1 %vm232_vm1, %v2252_v45 }
  0x84   : > { %1705 = vmatmul.msk.f32.gmra.mxu2 %vm232_vm1, %v2263_v46 }
  0x85   : > { %1739 = vmatmul.msk.f32.gmra.mxu3 %vm232_vm1, %v2266_v47 }
  0x86   : > { %1773 = vmatmul.msk.f32.gmra.mxu0 %vm232_vm1, %v2114_v22 }
  0x8b   : > { %1688 = vmatmul.msk.f32.gmra.mxu1 %vm232_vm1, %v2266_v47 }
  0x8c   : > { %1706 = vmatmul.msk.f32.gmra.mxu2 %vm232_vm1, %v2277_v48 }
  0x8d   : > { %1740 = vmatmul.msk.f32.gmra.mxu3 %vm232_vm1, %v2280_v49 }
  0x8e   : > { %1774 = vmatmul.msk.f32.gmra.mxu0 %vm232_vm1, %v2047_v7 }
  0x90   : > { %v2290_v50 = vpop.f32.mrf.mxu1 }
  0x93   : > { %v302_v53 = vpop.f32.mrf.mxu0  ;;  %1689 = vmatmul.msk.f32.gmra.mxu1 %vm232_vm1, %v2280_v49 }
  0x94   : > { %1707 = vmatmul.msk.f32.gmra.mxu2 %vm232_vm1, %v2293_v51 }
  0x95   : > { %1741 = vmatmul.msk.f32.gmra.mxu3 %vm232_vm1, %v2296_v52 }
  0x96   : > { %1775 = vmatmul.msk.f32.gmra.mxu0 %vm232_vm1, %v2071_v13 }
  0x97   : > { %v2306_v54 = vpop.f32.mrf.mxu2 }
  0x98   : > { %v2308_v55 = vpop.f32.mrf.mxu3  ;;  %v2310_v56 = vpop.f32.mrf.mxu1 }
  0x9b   : > { %v305_v59 = vpop.f32.mrf.mxu0  ;;  %1690 = vmatmul.msk.f32.gmra.mxu1 %vm232_vm1, %v2296_v52 }
  0x9c   : > { %1708 = vmatmul.msk.f32.gmra.mxu2 %vm232_vm1, %v2313_v57 }
  0x9d   : > { %1742 = vmatmul.msk.f32.gmra.mxu3 %vm232_vm1, %v2316_v58 }
  0x9e   : > { %1776 = vmatmul.msk.f32.gmra.mxu0 %vm232_vm1, %v2097_v19 }
  0x9f   : > { %v2326_v60 = vpop.f32.mrf.mxu2 }
  0xa0   : > { %v2328_v61 = vpop.f32.mrf.mxu3  ;;  %v2330_v62 = vpop.f32.mrf.mxu1 }
  0xa1   : > { %2638 = vst [vmem:[#allocation3_spill] sm:$0xff] %v2328_v61 }
  0xa3   : > { %v308_v1 = vpop.f32.mrf.mxu0  ;;  %1691 = vmatmul.msk.f32.gmra.mxu1 %vm232_vm1, %v2316_v58 }
  0xa4   : > { %1709 = vmatmul.msk.f32.gmra.mxu2 %vm232_vm1, %v2333_v63 }
  0xa5   : > { %1743 = vmatmul.msk.f32.gmra.mxu3 %vm232_vm1, %v2336_v0 }
  0xa6   : > { %1777 = vmatmul.msk.f32.gmra.mxu0 %vm232_vm1, %v2117_v23 }
  0xa7   : > { %v2346_v2 = vpop.f32.mrf.mxu2 }
  0xa8   : > { %v2348_v3 = vpop.f32.mrf.mxu3  ;;  %v2350_v4 = vpop.f32.mrf.mxu1 }
  0xa9   : > { %2639 = vst [vmem:[#allocation4_spill] sm:$0xff] %v2348_v3 }
  0xab   : > { %v311_v12 = vpop.f32.mrf.mxu0  ;;  %1692 = vmatmul.msk.f32.gmra.mxu1 %vm232_vm1, %v2336_v0 }
  0xac   : > { %1710 = vmatmul.msk.f32.gmra.mxu2 %vm232_vm1, %v2353_v8 }
  0xad   : > { %1744 = vmatmul.msk.f32.gmra.mxu3 %vm232_vm1, %v2356_v9 }
  0xae   : > { %1778 = vmatmul.msk.f32.gmra.mxu0 %vm232_vm1, %v2359_v14 }
  0xaf   : > { %v2369_v15 = vpop.f32.mrf.mxu2 }
  0xb0   : > { %v2371_v16 = vpop.f32.mrf.mxu3  ;;  %v418_v25 = vpop.f32.mrf.mxu1 }
  0xb1   : > { %2643 = vst [vmem:[#allocation8_spill] sm:$0xff] %v2371_v16  ;;  %v419_v27 = vadd.f32 %v418_v25, %v302_v53 }
  0xb3   : > { %v855_v26 = vpop.f32.mrf.mxu0  ;;  %1797 = vmatmul.msk.f32.vlgmr.msra.gmra.mxu1 %vm232_vm1, %v2138_v28 }
  0xb4   : > { %1831 = vmatmul.msk.f32.vlgmr.msra.gmra.mxu2 %vm232_vm1, %v2141_v29 }
  0xb5   : > { %1865 = vmatmul.msk.f32.vlgmr.msra.gmra.mxu3 %vm232_vm1, %v2100_v20 }
  0xb6   : > { %1899 = vmatmul.msk.f32.vlgmr.msra.gmra.mxu0 %vm232_vm1, %v2151_v30 }
  0xb7   : > { %v552_v3 = vpop.f32.mrf.mxu2 }
  0xb8   : > { %v600_v14 = vadd.f32 %v552_v3, %v419_v27  ;;  %v705_v9 = vpop.f32.mrf.mxu3  ;;  %v421_v61 = vpop.f32.mrf.mxu1 }
  0xb9   : > { %v422_v20 = vadd.f32 %v421_v61, %v305_v59 }
  0xba   : > { %v753_v16 = vadd.f32 %v705_v9, %v600_v14 }
  0xbb   : > { %v858_v8 = vpop.f32.mrf.mxu0  ;;  %1798 = vmatmul.msk.f32.gmra.mxu1 %vm232_vm1, %v2151_v30 }
  0xbc   : > { %v2381_v23 = vadd.f32 %v855_v26, %v753_v16  ;;  %1832 = vmatmul.msk.f32.gmra.mxu2 %vm232_vm1, %v2154_v31 }
  0xbd   : > { %1866 = vmatmul.msk.f32.gmra.mxu3 %vm232_vm1, %v2120_v24 }
  0xbe   : > { %1900 = vmatmul.msk.f32.gmra.mxu0 %vm232_vm1, %v2165_v32 }
  0xbf   : > { %v555_v28 = vpop.f32.mrf.mxu2 }
  0xc0   : > { %v601_v29 = vadd.f32 %v555_v28, %v422_v20  ;;  %v708_v53 = vpop.f32.mrf.mxu3  ;;  %v424_v3 = vpop.f32.mrf.mxu1 }
  0xc1   : > { %v425_v24 = vadd.f32 %v424_v3, %v308_v1 }
  0xc2   : > { %v754_v9 = vadd.f32 %v708_v53, %v601_v29 }
  0xc3   : > { %v861_v14 = vpop.f32.mrf.mxu0  ;;  %1799 = vmatmul.msk.f32.gmra.mxu1 %vm232_vm1, %v2165_v32 }
  0xc4   : > { %v2391_v16 = vadd.f32 %v858_v8, %v754_v9  ;;  %1833 = vmatmul.msk.f32.gmra.mxu2 %vm232_vm1, %v2168_v33 }
  0xc5   : > { %1867 = vmatmul.msk.f32.gmra.mxu3 %vm232_vm1, %v2041_v5 }
  0xc6   : > { %1901 = vmatmul.msk.f32.gmra.mxu0 %vm232_vm1, %v2179_v34 }
  0xc7   : > { %v558_v30 = vpop.f32.mrf.mxu2 }
  0xc8   : > { %v602_v31 = vadd.f32 %v558_v30, %v425_v24  ;;  %v711_v59 = vpop.f32.mrf.mxu3  ;;  %v427_v61 = vpop.f32.mrf.mxu1 }
  0xc9   : > { %v428_v5 = vadd.f32 %v427_v61, %v311_v12 }
  0xca   : > { %v755_v25 = vadd.f32 %v711_v59, %v602_v31 }
  0xcb   : > { %v864_v8 = vpop.f32.mrf.mxu0  ;;  %1800 = vmatmul.msk.f32.gmra.mxu1 %vm232_vm1, %v2179_v34 }
  0xcc   : > { %v2401_v26 = vadd.f32 %v861_v14, %v755_v25  ;;  %1834 = vmatmul.msk.f32.gmra.mxu2 %vm232_vm1, %v2182_v35 }
  0xcd   : > { %1868 = vmatmul.msk.f32.gmra.mxu3 %vm232_vm1, %v2061_v10 }
  0xce   : > { %1902 = vmatmul.msk.f32.gmra.mxu0 %vm232_vm1, %v2193_v36 }
  0xcf   : > { %v561_v32 = vpop.f32.mrf.mxu2 }
  0xd0   : > { %v603_v33 = vadd.f32 %v561_v32, %v428_v5  ;;  %v714_v1 = vpop.f32.mrf.mxu3  ;;  %v430_v27 = vpop.f32.mrf.mxu1 }
  0xd1   : > { %v431_v10 = vadd.f32 %v430_v27, %v2290_v50 }
  0xd2   : > { %v756_v20 = vadd.f32 %v714_v1, %v603_v33 }
  0xd3   : > { %v867_v28 = vpop.f32.mrf.mxu0  ;;  %1801 = vmatmul.msk.f32.gmra.mxu1 %vm232_vm1, %v2193_v36 }
  0xd4   : > { %v2411_v29 = vadd.f32 %v864_v8, %v756_v20  ;;  %1835 = vmatmul.msk.f32.gmra.mxu2 %vm232_vm1, %v2196_v37 }
  0xd5   : > { %1869 = vmatmul.msk.f32.gmra.mxu3 %vm232_vm1, %v2091_v17 }
  0xd6   : > { %1903 = vmatmul.msk.f32.gmra.mxu0 %vm232_vm1, %v2207_v38 }
  0xd7   : > { %v564_v34 = vpop.f32.mrf.mxu2 }
  0xd8   : > { %v604_v35 = vadd.f32 %v564_v34, %v431_v10  ;;  %v717_v12 = vpop.f32.mrf.mxu3  ;;  %v433_v53 = vpop.f32.mrf.mxu1 }
  0xd9   : > { %v434_v17 = vadd.f32 %v433_v53, %v2310_v56 }
  0xda   : > { %v757_v3 = vadd.f32 %v717_v12, %v604_v35 }
  0xdb   : > { %v870_v9 = vpop.f32.mrf.mxu0  ;;  %1802 = vmatmul.msk.f32.gmra.mxu1 %vm232_vm1, %v2207_v38 }
  0xdc   : > { %v2422_v14 = vadd.f32 %v867_v28, %v757_v3  ;;  %1836 = vmatmul.msk.f32.gmra.mxu2 %vm232_vm1, %v2210_v39 }
  0xdd   : > { %1870 = vmatmul.msk.f32.gmra.mxu3 %vm232_vm1, %v2111_v21 }
  0xde   : > { %1904 = vmatmul.msk.f32.gmra.mxu0 %vm232_vm1, %v2221_v40 }
  0xdf   : > { %v567_v36 = vpop.f32.mrf.mxu2 }
  0xe0   : > { %v605_v37 = vadd.f32 %v567_v36, %v434_v17  ;;  %v720_v50 = vpop.f32.mrf.mxu3  ;;  %v436_v24 = vpop.f32.mrf.mxu1 }
  0xe1   : > { %v437_v21 = vadd.f32 %v436_v24, %v2330_v62 }
  0xe2   : > { %v758_v30 = vadd.f32 %v720_v50, %v605_v37 }
  0xe3   : > { %v873_v31 = vpop.f32.mrf.mxu0  ;;  %1803 = vmatmul.msk.f32.gmra.mxu1 %vm232_vm1, %v2221_v40 }
  0xe4   : > { %v2433_v59 = vadd.f32 %v870_v9, %v758_v30  ;;  %1837 = vmatmul.msk.f32.gmra.mxu2 %vm232_vm1, %v2224_v41 }
  0xe5   : > { %1871 = vmatmul.msk.f32.gmra.mxu3 %vm232_vm1, %v2044_v6 }
  0xe6   : > { %1905 = vmatmul.msk.f32.gmra.mxu0 %vm232_vm1, %v2235_v42 }
  0xe7   : > { %v570_v38 = vpop.f32.mrf.mxu2 }
  0xe8   : > { %v606_v39 = vadd.f32 %v570_v38, %v437_v21  ;;  %v723_v56 = vpop.f32.mrf.mxu3  ;;  %v439_v61 = vpop.f32.mrf.mxu1 }
  0xe9   : > { %v440_v6 = vadd.f32 %v439_v61, %v2350_v4 }
  0xea   : > { %v759_v25 = vadd.f32 %v723_v56, %v606_v39 }
  0xeb   : > { %v876_v8 = vpop.f32.mrf.mxu0  ;;  %1804 = vmatmul.msk.f32.gmra.mxu1 %vm232_vm1, %v2235_v42 }
  0xec   : > { %v2444_v5 = vadd.f32 %v873_v31, %v759_v25  ;;  %1838 = vmatmul.msk.f32.gmra.mxu2 %vm232_vm1, %v2238_v43 }
  0xed   : > { %1872 = vmatmul.msk.f32.gmra.mxu3 %vm232_vm1, %v2064_v11 }
  0xee   : > { %1906 = vmatmul.msk.f32.gmra.mxu0 %vm232_vm1, %v2249_v44 }
  0xef   : > { %v573_v40 = vpop.f32.mrf.mxu2 }
  0xf0   : > { %v607_v41 = vadd.f32 %v573_v40, %v440_v6  ;;  %v726_v62 = vpop.f32.mrf.mxu3  ;;  %v442_v32 = vpop.f32.mrf.mxu1 }
  0xf1   : > { %v443_v11 = vadd.f32 %v442_v32, %v2306_v54  ;;  %v2648_v32 = vld [vmem:[#allocation7_spill] sm:$0xff] }
  0xf2   : > { %v760_v33 = vadd.f32 %v726_v62, %v607_v41  ;;  %v1794_v62 = vld [vmem:[%s2038_s29 + $0x104] sm:$0xff] }
  0xf3   : > { %v879_v1 = vpop.f32.mrf.mxu0  ;;  %1805 = vmatmul.msk.f32.gmra.mxu1 %vm232_vm1, %v2249_v44 }
  0xf4   : > { %v2455_v27 = vadd.f32 %v876_v8, %v760_v33  ;;  %1839 = vmatmul.msk.f32.gmra.mxu2 %vm232_vm1, %v2252_v45  ;;  %v2649_v33 = vld [vmem:[#allocation4_spill] sm:$0xff] }
  0xf5   : > { %1873 = vmatmul.msk.f32.gmra.mxu3 %vm232_vm1, %v2094_v18 }
  0xf6   : > { %1907 = vmatmul.msk.f32.gmra.mxu0 %vm232_vm1, %v2263_v46 }
  0xf7   : > { %v576_v42 = vpop.f32.mrf.mxu2 }
  0xf8   : > { %v608_v43 = vadd.f32 %v576_v42, %v443_v11  ;;  %v729_v4 = vpop.f32.mrf.mxu3  ;;  %v445_v20 = vpop.f32.mrf.mxu1 }
  0xf9   : > { %v446_v18 = vadd.f32 %v445_v20, %v2326_v60  ;;  %v1828_v20 = vld [vmem:[%s2038_s29 + $0x110] sm:$0xff] }
  0xfa   : > { %v761_v28 = vadd.f32 %v729_v4, %v608_v43 }
  0xfb   : > { %v882_v10 = vpop.f32.mrf.mxu0  ;;  %1806 = vmatmul.msk.f32.gmra.mxu1 %vm232_vm1, %v2263_v46 }
  0xfc   : > { %v2466_v34 = vadd.f32 %v879_v1, %v761_v28  ;;  %1840 = vmatmul.msk.f32.gmra.mxu2 %vm232_vm1, %v2266_v47 }
  0xfd   : > { %1874 = vmatmul.msk.f32.gmra.mxu3 %vm232_vm1, %v2114_v22 }
  0xfe   : > { %1908 = vmatmul.msk.f32.gmra.mxu0 %vm232_vm1, %v2277_v48 }
  0xff   : > { %v579_v44 = vpop.f32.mrf.mxu2 }
 0x100   : > { %v609_v45 = vadd.f32 %v579_v44, %v446_v18  ;;  %v732_v54 = vpop.f32.mrf.mxu3  ;;  %v448_v35 = vpop.f32.mrf.mxu1  ;;  %v1896_v44 = vld [vmem:[%s2038_s29 + $0x114] sm:$0xff] }
 0x101   : > { %v449_v22 = vadd.f32 %v448_v35, %v2346_v2 }
 0x102   : > { %v762_v12 = vadd.f32 %v732_v54, %v609_v45  ;;  %v2650_v54 = vld [vmem:[#allocation8_spill] sm:$0xff] }
 0x103   : > { %v885_v53 = vpop.f32.mrf.mxu0  ;;  %1807 = vmatmul.msk.f32.gmra.mxu1 %vm232_vm1, %v2277_v48 }
 0x104   : > { %v2477_v3 = vadd.f32 %v882_v10, %v762_v12  ;;  %1841 = vmatmul.msk.f32.gmra.mxu2 %vm232_vm1, %v2280_v49  ;;  %v1862_v10 = vld [vmem:[%s2038_s29 + $0x112] sm:$0xff] }
 0x105   : > { %1875 = vmatmul.msk.f32.gmra.mxu3 %vm232_vm1, %v2047_v7 }
 0x106   : > { %1909 = vmatmul.msk.f32.gmra.mxu0 %vm232_vm1, %v2293_v51 }
 0x107   : > { %v582_v46 = vpop.f32.mrf.mxu2 }
 0x108   : > { %v610_v47 = vadd.f32 %v582_v46, %v449_v22  ;;  %v735_v60 = vpop.f32.mrf.mxu3  ;;  %v451_v9 = vpop.f32.mrf.mxu1 }
 0x109   : > { %v452_v7 = vadd.f32 %v451_v9, %v2369_v15 }
 0x10a   : > { %v763_v17 = vadd.f32 %v735_v60, %v610_v47 }
 0x10b   : > { %v888_v36 = vpop.f32.mrf.mxu0  ;;  %1808 = vmatmul.msk.f32.gmra.mxu1 %vm232_vm1, %v2293_v51 }
 0x10c   : > { %v2488_v37 = vadd.f32 %v885_v53, %v763_v17  ;;  %1842 = vmatmul.msk.f32.gmra.mxu2 %vm232_vm1, %v2296_v52 }
 0x10d   : > { %1876 = vmatmul.msk.f32.gmra.mxu3 %vm232_vm1, %v2071_v13 }
 0x10e   : > { %1910 = vmatmul.msk.f32.gmra.mxu0 %vm232_vm1, %v2313_v57 }
 0x10f   : > { %v585_v48 = vpop.f32.mrf.mxu2 }
 0x110   : > { %v611_v49 = vadd.f32 %v585_v48, %v452_v7  ;;  %v738_v2 = vpop.f32.mrf.mxu3  ;;  %v454_v50 = vpop.f32.mrf.mxu1 }
 0x111   : > { %v455_v13 = vadd.f32 %v454_v50, %v2308_v55  ;;  %v2646_v55 = vld [vmem:[#allocation3_spill] sm:$0xff]  ;;  %v2549_v50 = vld [vmem:[%s2630_s2] ss:$0 sm:$0xff] }
 0x112   : > { %v764_v24 = vadd.f32 %v738_v2, %v611_v49 }
 0x113   : > { %v891_v30 = vpop.f32.mrf.mxu0  ;;  %1809 = vmatmul.msk.f32.gmra.mxu1 %vm232_vm1, %v2313_v57  ;;  %v2645_v57 = vld [vmem:[#allocation5_spill] sm:$0xff] }
 0x114   : > { %v2499_v31 = vadd.f32 %v888_v36, %v764_v24  ;;  %1843 = vmatmul.msk.f32.gmra.mxu2 %vm232_vm1, %v2316_v58 }
 0x115   : > { %1877 = vmatmul.msk.f32.gmra.mxu3 %vm232_vm1, %v2097_v19  ;;  %v2644_v19 = vld [vmem:[#allocation2_spill] sm:$0xff] }
 0x116   : > { %1911 = vmatmul.msk.f32.gmra.mxu0 %vm232_vm1, %v2333_v63 }
 0x117   : > { %v588_v51 = vpop.f32.mrf.mxu2 }
 0x118   : > { %v612_v52 = vadd.f32 %v588_v51, %v455_v13  ;;  %v741_v15 = vpop.f32.mrf.mxu3  ;;  %v457_v21 = vpop.f32.mrf.mxu1 }
 0x119   : > { %v458_v58 = vadd.f32 %v457_v21, %v2646_v55 }
 0x11a   : > { %v765_v38 = vadd.f32 %v741_v15, %v612_v52 }
 0x11b   : > { %v894_v39 = vpop.f32.mrf.mxu0  ;;  %1810 = vmatmul.msk.f32.gmra.mxu1 %vm232_vm1, %v2333_v63 }
 0x11c   : > { %v2510_v56 = vadd.f32 %v891_v30, %v765_v38  ;;  %1844 = vmatmul.msk.f32.gmra.mxu2 %vm232_vm1, %v2336_v0  ;;  %v2647_v0 = vld [vmem:[#allocation6_spill] sm:$0xff] }
 0x11d   : > { %1878 = vmatmul.msk.f32.gmra.mxu3 %vm232_vm1, %v2644_v19 }
 0x11e   : > { %1912 = vmatmul.msk.f32.gmra.mxu0 %vm232_vm1, %v2645_v57 }
 0x11f   : > { %v591_v61 = vpop.f32.mrf.mxu2 }
 0x120   : > { %v613_v25 = vadd.f32 %v591_v61, %v458_v58  ;;  %v744_v8 = vpop.f32.mrf.mxu3  ;;  %v460_v6 = vpop.f32.mrf.mxu1 }
 0x121   : > { %v461_v1 = vadd.f32 %v460_v6, %v2649_v33 }
 0x122   : > { %v766_v40 = vadd.f32 %v744_v8, %v613_v25 }
 0x123   : > { %v897_v41 = vpop.f32.mrf.mxu0  ;;  %1811 = vmatmul.msk.f32.gmra.mxu1 %vm232_vm1, %v2645_v57 }
 0x124   : > { %v2521_v63 = vadd.f32 %v894_v39, %v766_v40  ;;  %1845 = vmatmul.msk.f32.gmra.mxu2 %vm232_vm1, %v2647_v0 }
 0x125   : > { %1879 = vmatmul.msk.f32.gmra.mxu3 %vm232_vm1, %v2648_v32 }
 0x126   : > { %1913 = vmatmul.msk.f32.gmra.mxu0 %vm232_vm1, %v1794_v62 }
 0x127   : > { %v594_v11 = vpop.f32.mrf.mxu2 }
 0x128   : > { %v614_v42 = vadd.f32 %v594_v11, %v461_v1  ;;  %v747_v43 = vpop.f32.mrf.mxu3  ;;  %v463_v4 = vpop.f32.mrf.mxu1 }
 0x129   : > { %v464_v35 = vadd.f32 %v463_v4, %v2650_v54 }
 0x12a   : > { %v767_v28 = vadd.f32 %v747_v43, %v614_v42 }
 0x12b   : > { %v900_v18 = vpop.f32.mrf.mxu0  ;;  %1812 = vmatmul.msk.f32.gmra.mxu1 %vm232_vm1, %v1794_v62 }
 0x12c   : > { %v2535_v45 = vadd.f32 %v897_v41, %v767_v28  ;;  %1846 = vmatmul.msk.f32.gmra.mxu2 %vm232_vm1, %v1828_v20 }
 0x12d   : > { %1880 = vmatmul.msk.f32.gmra.mxu3 %vm232_vm1, %v1862_v10 }
 0x12e   : > { %1914 = vmatmul.msk.f32.gmra.mxu0 %vm232_vm1, %v1896_v44 }
 0x12f   : > { %v597_v12 = vpop.f32.mrf.mxu2 }
 0x130   : > { %v615_v53 = vadd.f32 %v597_v12, %v464_v35  ;;  %v750_v22 = vpop.f32.mrf.mxu3  ;;  %v1005_v46 = vpop.f32.mrf.mxu1 }
 0x131   : > { %v1053_v17 = vadd.f32 %v1005_v46, %v2381_v23 }
 0x132   : > { %v768_v47 = vadd.f32 %v750_v22, %v615_v53 }
 0x133   : > { %v1458_v60 = vpop.f32.mrf.mxu0 }
 0x134   : > { %v2542_v9 = vadd.f32 %v900_v18, %v768_v47 }
 0x137   : > { %v1158_v36 = vpop.f32.mrf.mxu2 }
 0x138   : > { %v1206_v7 = vadd.f32 %v1158_v36, %v1053_v17  ;;  %v1308_v48 = vpop.f32.mrf.mxu3  ;;  %v1008_v49 = vpop.f32.mrf.mxu1 }
 0x139   : > { %v1054_v23 = vadd.f32 %v1008_v49, %v2391_v16 }
 0x13a   : > { %v1356_v2 = vadd.f32 %v1308_v48, %v1206_v7 }
 0x13b   : > { %v1461_v24 = vpop.f32.mrf.mxu0 }
 0x13c   : > { %v1506_v30 = vadd.f32 %v1458_v60, %v1356_v2 }
 0x13e   : > { %v1526_v13 = vadd.f32 %v2549_v50, %v1506_v30 }
 0x13f   : > { %v1161_v51 = vpop.f32.mrf.mxu2 }
 0x140   : > { %1543 = vst.msk [vmem:[%s2554_s20] sm:$0xff] %vm1542_vm2, %v1526_v13  ;;  %v1207_v52 = vadd.f32 %v1161_v51, %v1054_v23  ;;  %v1311_v15 = vpop.f32.mrf.mxu3  ;;  %v1011_v21 = vpop.f32.mrf.mxu1 }
 0x141   : > { %v1055_v57 = vadd.f32 %v1011_v21, %v2401_v26 }
 0x142   : > { %v1357_v38 = vadd.f32 %v1311_v15, %v1207_v52 }
 0x143   : > { %v1464_v39 = vpop.f32.mrf.mxu0 }
 0x144   : > { %v1507_v19 = vadd.f32 %v1461_v24, %v1357_v38 }
 0x146   : > { %v1527_v55 = vadd.f32 %v2549_v50, %v1507_v19 }
 0x147   : > { %v1164_v58 = vpop.f32.mrf.mxu2 }
 0x148   : > { %1544 = vst.msk [vmem:[%s2554_s20 + $0x8] sm:$0xff] %vm1542_vm2, %v1527_v55  ;;  %v1208_v16 = vadd.f32 %v1164_v58, %v1055_v57  ;;  %v1314_v61 = vpop.f32.mrf.mxu3  ;;  %v1014_v25 = vpop.f32.mrf.mxu1 }
 0x149   : > { %v1056_v41 = vadd.f32 %v1014_v25, %v2411_v29 }
 0x14a   : > { %v1358_v8 = vadd.f32 %v1314_v61, %v1208_v16 }
 0x14b   : > { %v1467_v6 = vpop.f32.mrf.mxu0 }
 0x14c   : > { %v1508_v40 = vadd.f32 %v1464_v39, %v1358_v8 }
 0x14e   : > { %v1528_v0 = vadd.f32 %v2549_v50, %v1508_v40 }
 0x14f   : > { %v1167_v62 = vpop.f32.mrf.mxu2 }
 0x150   : > { %1545 = vst.msk [vmem:[%s2554_s20 + $0x10] sm:$0xff] %vm1542_vm2, %v1528_v0  ;;  %v1209_v26 = vadd.f32 %v1167_v62, %v1056_v41  ;;  %v1317_v32 = vpop.f32.mrf.mxu3  ;;  %v1017_v33 = vpop.f32.mrf.mxu1 }
 0x151   : > { %v1057_v43 = vadd.f32 %v1017_v33, %v2422_v14 }
 0x152   : > { %v1359_v1 = vadd.f32 %v1317_v32, %v1209_v26 }
 0x153   : > { %v1470_v11 = vpop.f32.mrf.mxu0 }
 0x154   : > { %v1509_v42 = vadd.f32 %v1467_v6, %v1359_v1 }
 0x156   : > { %v1529_v4 = vadd.f32 %v2549_v50, %v1509_v42 }
 0x157   : > { %v1170_v20 = vpop.f32.mrf.mxu2 }
 0x158   : > { %1546 = vst.msk [vmem:[%s2554_s20 + $0x18] sm:$0xff] %vm1542_vm2, %v1529_v4  ;;  %v1210_v29 = vadd.f32 %v1170_v20, %v1057_v43  ;;  %v1320_v28 = vpop.f32.mrf.mxu3  ;;  %v1020_v10 = vpop.f32.mrf.mxu1 }
 0x159   : > { %v1058_v35 = vadd.f32 %v1020_v10, %v2433_v59 }
 0x15a   : > { %v1360_v18 = vadd.f32 %v1320_v28, %v1210_v29 }
 0x15b   : > { %v1473_v44 = vpop.f32.mrf.mxu0 }
 0x15c   : > { %v1510_v54 = vadd.f32 %v1470_v11, %v1360_v18 }
 0x15e   : > { %v1530_v12 = vadd.f32 %v2549_v50, %v1510_v54 }
 0x15f   : > { %v1173_v53 = vpop.f32.mrf.mxu2 }
 0x160   : > { %1547 = vst.msk [vmem:[%s2554_s20 + $0x20] sm:$0xff] %vm1542_vm2, %v1530_v12  ;;  %v1211_v14 = vadd.f32 %v1173_v53, %v1058_v35  ;;  %v1323_v22 = vpop.f32.mrf.mxu3  ;;  %v1023_v46 = vpop.f32.mrf.mxu1 }
 0x161   : > { %v1059_v36 = vadd.f32 %v1023_v46, %v2444_v5 }
 0x162   : > { %v1361_v47 = vadd.f32 %v1323_v22, %v1211_v14 }
 0x163   : > { %v1476_v60 = vpop.f32.mrf.mxu0 }
 0x164   : > { %v1511_v17 = vadd.f32 %v1473_v44, %v1361_v47 }
 0x166   : > { %v1531_v7 = vadd.f32 %v2549_v50, %v1511_v17 }
 0x167   : > { %v1176_v48 = vpop.f32.mrf.mxu2 }
 0x168   : > { %1548 = vst.msk [vmem:[%s2554_s20 + $0x28] sm:$0xff] %vm1542_vm2, %v1531_v7  ;;  %v1212_v59 = vadd.f32 %v1176_v48, %v1059_v36  ;;  %v1326_v49 = vpop.f32.mrf.mxu3  ;;  %v1026_v2 = vpop.f32.mrf.mxu1 }
 0x169   : > { %v1060_v13 = vadd.f32 %v1026_v2, %v2455_v27 }
 0x16a   : > { %v1362_v24 = vadd.f32 %v1326_v49, %v1212_v59 }
 0x16b   : > { %v1479_v30 = vpop.f32.mrf.mxu0 }
 0x16c   : > { %v1512_v23 = vadd.f32 %v1476_v60, %v1362_v24 }
 0x16e   : > { %v1532_v51 = vadd.f32 %v2549_v50, %v1512_v23 }
 0x16f   : > { %v1179_v52 = vpop.f32.mrf.mxu2 }
 0x170   : > { %1549 = vst.msk [vmem:[%s2554_s20 + $0x30] sm:$0xff] %vm1542_vm2, %v1532_v51  ;;  %v1213_v5 = vadd.f32 %v1179_v52, %v1060_v13  ;;  %v1329_v15 = vpop.f32.mrf.mxu3  ;;  %v1029_v21 = vpop.f32.mrf.mxu1 }
 0x171   : > { %v1061_v57 = vadd.f32 %v1029_v21, %v2466_v34 }
 0x172   : > { %v1363_v38 = vadd.f32 %v1329_v15, %v1213_v5 }
 0x173   : > { %v1482_v39 = vpop.f32.mrf.mxu0 }
 0x174   : > { %v1513_v19 = vadd.f32 %v1479_v30, %v1363_v38 }
 0x176   : > { %v1533_v55 = vadd.f32 %v2549_v50, %v1513_v19 }
 0x177   : > { %v1182_v58 = vpop.f32.mrf.mxu2 }
 0x178   : > { %1550 = vst.msk [vmem:[%s2554_s20 + $0x38] sm:$0xff] %vm1542_vm2, %v1533_v55  ;;  %v1214_v27 = vadd.f32 %v1182_v58, %v1061_v57  ;;  %v1332_v16 = vpop.f32.mrf.mxu3  ;;  %v1032_v61 = vpop.f32.mrf.mxu1 }
 0x179   : > { %v1062_v40 = vadd.f32 %v1032_v61, %v2477_v3 }
 0x17a   : > { %v1364_v25 = vadd.f32 %v1332_v16, %v1214_v27 }
 0x17b   : > { %v1485_v8 = vpop.f32.mrf.mxu0 }
 0x17c   : > { %v1514_v6 = vadd.f32 %v1482_v39, %v1364_v25 }
 0x17e   : > { %v1534_v41 = vadd.f32 %v2549_v50, %v1514_v6 }
 0x17f   : > { %v1185_v0 = vpop.f32.mrf.mxu2 }
 0x180   : > { %1551 = vst.msk [vmem:[%s2554_s20 + $0x40] sm:$0xff] %vm1542_vm2, %v1534_v41  ;;  %v1215_v34 = vadd.f32 %v1185_v0, %v1062_v40  ;;  %v1335_v62 = vpop.f32.mrf.mxu3  ;;  %v1035_v26 = vpop.f32.mrf.mxu1 }
 0x181   : > { %v1063_v11 = vadd.f32 %v1035_v26, %v2488_v37 }
 0x182   : > { %v1365_v32 = vadd.f32 %v1335_v62, %v1215_v34 }
 0x183   : > { %v1488_v33 = vpop.f32.mrf.mxu0 }
 0x184   : > { %v1515_v1 = vadd.f32 %v1485_v8, %v1365_v32 }
 0x186   : > { %v1535_v42 = vadd.f32 %v2549_v50, %v1515_v1 }
 0x187   : > { %v1188_v43 = vpop.f32.mrf.mxu2 }
 0x188   : > { %1552 = vst.msk [vmem:[%s2554_s20 + $0x48] sm:$0xff] %vm1542_vm2, %v1535_v42  ;;  %v1216_v3 = vadd.f32 %v1188_v43, %v1063_v11  ;;  %v1338_v4 = vpop.f32.mrf.mxu3  ;;  %v1038_v20 = vpop.f32.mrf.mxu1 }
 0x189   : > { %v1064_v18 = vadd.f32 %v1038_v20, %v2499_v31 }
 0x18a   : > { %v1366_v29 = vadd.f32 %v1338_v4, %v1216_v3 }
 0x18b   : > { %v1491_v28 = vpop.f32.mrf.mxu0 }
 0x18c   : > { %v1516_v10 = vadd.f32 %v1488_v33, %v1366_v29 }
 0x18e   : > { %v1536_v44 = vadd.f32 %v2549_v50, %v1516_v10 }
 0x18f   : > { %v1191_v54 = vpop.f32.mrf.mxu2 }
 0x190   : > { %1553 = vst.msk [vmem:[%s2554_s20 + $0x50] sm:$0xff] %vm1542_vm2, %v1536_v44  ;;  %v1217_v37 = vadd.f32 %v1191_v54, %v1064_v18  ;;  %v1341_v35 = vpop.f32.mrf.mxu3  ;;  %v1041_v12 = vpop.f32.mrf.mxu1 }
 0x191   : > { %v1065_v46 = vadd.f32 %v1041_v12, %v2510_v56 }
 0x192   : > { %v1367_v53 = vadd.f32 %v1341_v35, %v1217_v37 }
 0x193   : > { %v1494_v14 = vpop.f32.mrf.mxu0 }
 0x194   : > { %v1517_v22 = vadd.f32 %v1491_v28, %v1367_v53 }
 0x196   : > { %v1537_v47 = vadd.f32 %v2549_v50, %v1517_v22 }
 0x197   : > { %v1194_v60 = vpop.f32.mrf.mxu2 }
 0x198   : > { %1554 = vst.msk [vmem:[%s2554_s20 + $0x58] sm:$0xff] %vm1542_vm2, %v1537_v47  ;;  %v1218_v31 = vadd.f32 %v1194_v60, %v1065_v46  ;;  %v1344_v17 = vpop.f32.mrf.mxu3  ;;  %v1044_v36 = vpop.f32.mrf.mxu1 }
 0x199   : > { %v1066_v49 = vadd.f32 %v1044_v36, %v2521_v63 }
 0x19a   : > { %v1368_v7 = vadd.f32 %v1344_v17, %v1218_v31 }
 0x19b   : > { %v1497_v59 = vpop.f32.mrf.mxu0 }
 0x19c   : > { %v1518_v48 = vadd.f32 %v1494_v14, %v1368_v7 }
 0x19e   : > { %v1538_v2 = vadd.f32 %v2549_v50, %v1518_v48 }
 0x19f   : > { %v1197_v24 = vpop.f32.mrf.mxu2 }
 0x1a0   : > { %1555 = vst.msk [vmem:[%s2554_s20 + $0x60] sm:$0xff] %vm1542_vm2, %v1538_v2  ;;  %v1219_v56 = vadd.f32 %v1197_v24, %v1066_v49  ;;  %v1347_v30 = vpop.f32.mrf.mxu3  ;;  %v1047_v23 = vpop.f32.mrf.mxu1 }
 0x1a1   : > { %v1067_v52 = vadd.f32 %v1047_v23, %v2535_v45 }
 0x1a2   : > { %v1369_v13 = vadd.f32 %v1347_v30, %v1219_v56 }
 0x1a3   : > { %v1500_v21 = vpop.f32.mrf.mxu0 }
 0x1a4   : > { %v1519_v51 = vadd.f32 %v1497_v59, %v1369_v13 }
 0x1a6   : > { %v1539_v5 = vadd.f32 %v2549_v50, %v1519_v51 }
 0x1a7   : > { %v1200_v15 = vpop.f32.mrf.mxu2 }
 0x1a8   : > { %1556 = vst.msk [vmem:[%s2554_s20 + $0x68] sm:$0xff] %vm1542_vm2, %v1539_v5  ;;  %v1220_v63 = vadd.f32 %v1200_v15, %v1067_v52  ;;  %v1350_v38 = vpop.f32.mrf.mxu3  ;;  %v1050_v19 = vpop.f32.mrf.mxu1 }
 0x1a9   : > { %v1068_v55 = vadd.f32 %v1050_v19, %v2542_v9 }
 0x1aa   : > { %v1370_v39 = vadd.f32 %v1350_v38, %v1220_v63 }
 0x1ab   : > { %v1503_v61 = vpop.f32.mrf.mxu0 }
 0x1ac   : > { %v1520_v57 = vadd.f32 %v1500_v21, %v1370_v39 }
 0x1ae   : > { %v1540_v58 = vadd.f32 %v2549_v50, %v1520_v57 }
 0x1af   : > { %v1203_v27 = vpop.f32.mrf.mxu2 }
 0x1b0   : > { %1557 = vst.msk [vmem:[%s2554_s20 + $0x70] sm:$0xff] %vm1542_vm2, %v1540_v58  ;;  %v1221_v45 = vadd.f32 %v1203_v27, %v1068_v55  ;;  %v1353_v16 = vpop.f32.mrf.mxu3 }
 0x1b2   : > { %v1371_v25 = vadd.f32 %v1353_v16, %v1221_v45 }
 0x1b4   : > { %v1521_v8 = vadd.f32 %v1503_v61, %v1371_v25 }
 0x1b6   : > { %v1541_v6 = vadd.f32 %v2549_v50, %v1521_v8 }
 0x1b8   : > { %1558 = vst.msk [vmem:[%s2554_s20 + $0x78] sm:$0xff] %vm1542_vm2, %v1541_v6 }
 0x1b9 PF: > { %s13_s14 = sadd.s32 1, %s1969_s14   ;;  %s2651_s12 = smov %s1965_s13 }
 0x1ba   : > { %p10_p5 = scmp.ge.s32.totalorder %s13_s14, 4   ;;  %s2652_s13 = smov %s2654_s15 }
 0x1bc   :  { %12 = sbr.rel (!%p10_p5) target bundleno = 2 (0x2), region = 73 }

</bundles_post_ra>
